<compile_context>
chip_gen: v5e
topology: v5e:2x2
jax: 0.10.0
libtpu: 0.0.40
codegen_flags: <defaults>
</compile_context>

<pallas_src>
import inspect

import jax
import jax.numpy as jnp
from jax.experimental import pallas as pl
from jax.experimental.pallas import tpu as pltpu


def hyena_x_kernel(u_ref, win_ref, bin_ref, wconv_ref, bconv_ref,
                   wout_ref, bout_ref, o_ref, halo_ref):
    # NOTE(correctness): the halo carry below is only valid because the L axis is the
    # innermost (fastest-varying) grid dimension and is marked "arbitrary" (sequential on a
    # single core).  Do not reorder the grid or mark the L axis "parallel".
    lt = pl.program_id(1)                      # position along the (sequential) L axis

    Bt, Lt, D = u_ref.shape
    K, C = wconv_ref.shape                     # C = (order+1) * Dp, 128-lane aligned
    Dp = wout_ref.shape[0]                     # padded per-projection width (mult. of 128)
    Dout = wout_ref.shape[1]                   # padded output width (mult. of 128)
    PAD = halo_ref.shape[1]                    # halo rows (multiple of 8, >= K-1)
    base = PAD - (K - 1)

    # ---- in_proj: batch folded into M, bf16 MXU inputs, f32 accumulate -----------------
    x = u_ref[...].reshape(Bt * Lt, D).astype(win_ref.dtype)
    p = jnp.dot(x, win_ref[...], preferred_element_type=jnp.float32)
    p = (p + bin_ref[...]).reshape(Bt, Lt, C)              # f32 (Bt, Lt, C)

    # ---- causal depthwise conv along L (halo-only scratch, in-register taps) ------------
    acc = p * wconv_ref[K - 1:K, :] + bconv_ref[...]       # j = K-1 tap (no shift)
    if K > 1:
        @pl.when(lt == 0)
        def _():                                           # new sequence: zero the halo
            halo_ref[...] = jnp.zeros_like(halo_ref)

        # Join the sublane-aligned 8-row halo block with the in-register p.  Only output
        # rows < K-1 consume halo values; everything else comes straight from p.
        xp = jnp.concatenate([halo_ref[...], p], axis=1)   # (Bt, PAD + Lt, C)
        for j in range(K - 1):                             # K tiny & static -> unrolled
            acc = acc + xp[:, base + j: base + j + Lt, :] * wconv_ref[j:j + 1, :]

        # carry the last K-1 rows of p into the halo for the next L tile
        halo_ref[:, base:, :] = p[:, Lt - (K - 1):, :]

    # ---- gating (f32 on the VPU); q/k/v slices are 128-lane aligned ---------------------
    q = acc[:, :, 0 * Dp:1 * Dp]
    k = acc[:, :, 1 * Dp:2 * Dp]
    v = acc[:, :, 2 * Dp:3 * Dp]
    y = q * (k * v)                                        # (Bt, Lt, Dp) f32

    # ---- out_proj: batch folded into M, bf16 MXU inputs, f32 accumulate -----------------
    yb = y.reshape(Bt * Lt, Dp).astype(wout_ref.dtype)
    out = jnp.dot(yb, wout_ref[...], preferred_element_type=jnp.float32) + bout_ref[...]
    o_ref[...] = out.reshape(Bt, Lt, Dout).astype(o_ref.dtype)


def _single_buffer_kwargs():
    """pipeline_mode=pl.Buffered(1) if supported: constant-index weights never re-fetch,
    so double-buffering them is pure VMEM waste (matters for large D on v7x's 64 MiB)."""
    try:
        if hasattr(pl, "Buffered") and \
           "pipeline_mode" in inspect.signature(pl.BlockSpec).parameters:
            return {"pipeline_mode": pl.Buffered(1)}
    except (TypeError, ValueError):
        pass
    return {}


def _default_vmem_limit_bytes():
    """~3/4 of the chip's VMEM (96 MiB on v5e/v6e, 48 MiB on v7x); conservative fallback."""
    try:
        phys = int(pltpu.get_tpu_info().vmem_capacity_bytes)
        return min((phys * 3) // 4, 100 << 20)
    except Exception:
        return 48 << 20        # still a healthy raise over the 16/32 MiB scoped defaults


def hyena_x_forward(u, w_in, b_in, w_conv, b_conv, w_out, b_out, *,
                    block_b=None, block_l=None, matmul_dtype=jnp.bfloat16,
                    vmem_limit_bytes=None):
    """u: (B, L, D).  Weights already in kernel layout (PyTorch -> here):
         w_in   (D, (order+1)D) = in_proj.weight.T              b_in   (1, (order+1)D)
         w_conv (K, (order+1)D) = short_filter.weight[:,0,:].T  b_conv (1, (order+1)D)
         w_out  (D, D)          = out_proj.weight.T             b_out  (1, D)
    """
    B, L, D = u.shape
    K, C = w_conv.shape
    assert w_in.shape == (D, C) and C % D == 0
    n_proj = C // D                          # order + 1

    # ---- lane-align every projection to a multiple of 128 channels (no-op if D%128==0) --
    LANE = 128
    Dp = ((D + LANE - 1) // LANE) * LANE
    Cp = n_proj * Dp

    def pad_proj(a):                         # (..., n_proj*D) -> (..., n_proj*Dp), zeros
        lead = a.shape[:-1]
        a3 = a.reshape(lead + (n_proj, D))
        a3 = jnp.pad(a3, [(0, 0)] * len(lead) + [(0, 0), (0, Dp - D)])
        return a3.reshape(lead + (Cp,))

    w_in_p = pad_proj(w_in).astype(matmul_dtype)             # (D, Cp)   bf16
    b_in_p = pad_proj(b_in).astype(jnp.float32)              # (1, Cp)   f32
    w_conv_p = pad_proj(w_conv).astype(jnp.float32)          # (K, Cp)   f32
    b_conv_p = pad_proj(b_conv).astype(jnp.float32)          # (1, Cp)   f32
    w_out_p = jnp.pad(w_out, ((0, Dp - D), (0, Dp - D))).astype(matmul_dtype)  # (Dp, Dp)
    b_out_p = jnp.pad(b_out, ((0, 0), (0, Dp - D))).astype(jnp.float32)        # (1, Dp)

    u_c = u.astype(matmul_dtype)             # halve the kernel's u HBM read

    # ---- VMEM budget & tile sizes --------------------------------------------------------
    if vmem_limit_bytes is None:
        vmem_limit_bytes = _default_vmem_limit_bytes()

    if block_b is None:                      # keep parallel extent >= 2 (v7x: 2 TCs/chip)
        cap_b = max(1, min(8, B // 2)) if B >= 2 else 1
        Bt = 1
        for cand in range(1, cap_b + 1):
            if B % cand == 0:
                Bt = cand
    else:
        Bt = block_b

    weight_bytes = ((w_in_p.size + w_out_p.size) * 2
                    + (b_in_p.size + w_conv_p.size + b_conv_p.size + b_out_p.size) * 4)

    if block_l is None:
        if L % 8 != 0:
            Lt = L                           # tiny / odd L: a single full-extent tile
        else:
            # per (batch row, L row): pipelined u/out buffers + ~5 f32 C-wide temporaries
            bytes_per_row = 2 * D * 2 + 2 * Dp * 4 + 5 * Cp * 4 + Dp * 4
            avail = max((vmem_limit_bytes * 3) // 5 - weight_bytes, 1 << 20)
            cap_l = max(8, min(L, 1024, (avail // (Bt * bytes_per_row)) // 8 * 8))
            Lt = 8
            for cand in range(8, int(cap_l) + 1, 8):
                if L % cand == 0:
                    Lt = cand
    else:
        Lt = block_l

    assert B % Bt == 0 and L % Lt == 0
    assert Lt % 8 == 0 or Lt == L, "L tile must be a multiple of 8 (sublane tiling)"
    assert Lt >= K - 1, "L tile must cover the conv halo"

    nb, nl = B // Bt, L // Lt
    HALO = max(8, ((K - 1 + 7) // 8) * 8)    # halo scratch rows (sublane-aligned)

    # Weights/biases: full-array blocks, constant index maps, single-buffered if supported.
    wkw = _single_buffer_kwargs()

    def weight_spec(a):
        nd = a.ndim
        return pl.BlockSpec(a.shape, lambda b, l, _nd=nd: (0,) * _nd, **wkw)

    flops = (2 * B * L * D * Cp          # in_proj
             + 2 * B * L * Cp * K        # depthwise conv
             + 3 * B * L * Dp            # gating
             + 2 * B * L * Dp * Dp)      # out_proj
    bytes_accessed = u_c.size * 2 + B * L * Dp * 4 + weight_bytes

    out = pl.pallas_call(
        hyena_x_kernel,
        out_shape=jax.ShapeDtypeStruct((B, L, Dp), u.dtype),
        grid_spec=pltpu.PrefetchScalarGridSpec(
            num_scalar_prefetch=0,
            grid=(nb, nl),                   # L axis MUST stay innermost + "arbitrary"
            in_specs=[
                pl.BlockSpec((Bt, Lt, D), lambda b, l: (b, l, 0)),   # u tile (bf16)
                weight_spec(w_in_p),                                 # (D, Cp)  bf16
                weight_spec(b_in_p),                                 # (1, Cp)  f32
                weight_spec(w_conv_p),                               # (K, Cp)  f32
                weight_spec(b_conv_p),                               # (1, Cp)  f32
                weight_spec(w_out_p),                                # (Dp, Dp) bf16
                weight_spec(b_out_p),                                # (1, Dp)  f32
            ],
            out_specs=pl.BlockSpec((Bt, Lt, Dp), lambda b, l: (b, l, 0)),
            scratch_shapes=[pltpu.VMEM((Bt, HALO, Cp), jnp.float32)],
        ),
        compiler_params=pltpu.CompilerParams(
            dimension_semantics=("parallel", "arbitrary"),
            vmem_limit_bytes=int(vmem_limit_bytes)),
        cost_estimate=pl.CostEstimate(flops=int(flops), transcendentals=0,
                                      bytes_accessed=int(bytes_accessed)),
    )(u_c, w_in_p, b_in_p, w_conv_p, b_conv_p, w_out_p, b_out_p)

    return out if Dp == D else out[:, :, :D]


def reference_forward(u, w_in, b_in, w_conv, b_conv, w_out, b_out):
    """Plain-JAX f32 reference mirroring the PyTorch module (channels-last)."""
    B, L, D = u.shape
    K = w_conv.shape[0]
    p = u @ w_in + b_in                                            # (B, L, 3D)
    xp = jnp.concatenate([jnp.zeros((B, K - 1, p.shape[-1]), p.dtype), p], axis=1)
    acc = sum(xp[:, j:j + L, :] * w_conv[j][None, None, :] for j in range(K)) + b_conv
    q, k, v = acc[..., :D], acc[..., D:2 * D], acc[..., 2 * D:]
    y = q * (k * v)
    return y @ w_out + b_out


if __name__ == "__main__":
    # Small config consistent with the module: d_model=32, l_max=64, order=2, K=4.
    B, L, D, K = 4, 64, 32, 4
    order = 2
    C = (order + 1) * D

    key = jax.random.PRNGKey(0)
    ks = jax.random.split(key, 7)
    u = jax.random.normal(ks[0], (B, L, D), dtype=jnp.float32)

    # Deterministic synthetic parameters (PyTorch shapes, pre-transposed for the kernel):
    #   in_proj.weight  (3D, D)        -> stored as (D, 3D)
    #   out_proj.weight (D, D)         -> stored transposed as (D, D)
    #   short_filter.weight (3D, 1, K) -> stored as (K, 3D)
    w_in = jax.random.normal(ks[1], (D, C), dtype=jnp.float32) * 0.1
    b_in = jax.random.normal(ks[2], (1, C), dtype=jnp.float32) * 0.1
    w_conv = jax.random.normal(ks[3], (K, C), dtype=jnp.float32) * 0.1
    b_conv = jax.random.normal(ks[4], (1, C), dtype=jnp.float32) * 0.1
    w_out = jax.random.normal(ks[5], (D, D), dtype=jnp.float32) * 0.1
    b_out = jax.random.normal(ks[6], (1, D), dtype=jnp.float32) * 0.1

    # Bt=2 keeps a parallel extent of 2 (v7x megacore); Lt=32 exercises the L-tile carry.
    out = hyena_x_forward(u, w_in, b_in, w_conv, b_conv, w_out, b_out,
                          block_b=2, block_l=32)
    out = jax.block_until_ready(out)

    ref = reference_forward(u, w_in, b_in, w_conv, b_conv, w_out, b_out)
    assert out.shape == (B, L, D)
    # bf16 MXU inputs (f32 accumulation) -> compare against the f32 reference with a
    # bf16-appropriate tolerance; measured error is O(1e-3), real bugs are O(1e-1).
    max_err = jnp.max(jnp.abs(out - ref))
    assert jnp.allclose(out, ref, atol=2e-2, rtol=2e-2), f"mismatch: max abs err {max_err}"

    print("KERNEL_OK")
</pallas_src>

<mosaic_0001>
module attributes {stable_mosaic.version = 11 : i64} {
  func.func @hyena_x_kernel(%arg0: i32, %arg1: i32, %arg2: memref<2x32x32xbf16, #tpu.memory_space<vmem>>, %arg3: memref<32x384xbf16, #tpu.memory_space<vmem>>, %arg4: memref<1x384xf32, #tpu.memory_space<vmem>>, %arg5: memref<4x384xf32, #tpu.memory_space<vmem>>, %arg6: memref<1x384xf32, #tpu.memory_space<vmem>>, %arg7: memref<128x128xbf16, #tpu.memory_space<vmem>>, %arg8: memref<1x128xf32, #tpu.memory_space<vmem>>, %arg9: memref<2x32x128xf32, #tpu.memory_space<vmem>>, %arg10: memref<2x8x384xf32, #tpu.memory_space<vmem>>) attributes {dimension_semantics = [#tpu.dimension_semantics<parallel>, #tpu.dimension_semantics<arbitrary>], iteration_bounds = array<i64: 2, 2>, scalar_prefetch = 0 : i64, scratch_operands = 1 : i64, tpu.core_type = #tpu.core_type<tc>, window_params = [{transform_indices = @transform_0, window_bounds = array<i64: 2, 32, 32>}, {pipeline_mode = #tpu.pipeline_mode<synchronous>, transform_indices = @transform_1, window_bounds = array<i64: 32, 384>}, {pipeline_mode = #tpu.pipeline_mode<synchronous>, transform_indices = @transform_2, window_bounds = array<i64: 1, 384>}, {pipeline_mode = #tpu.pipeline_mode<synchronous>, transform_indices = @transform_3, window_bounds = array<i64: 4, 384>}, {pipeline_mode = #tpu.pipeline_mode<synchronous>, transform_indices = @transform_4, window_bounds = array<i64: 1, 384>}, {pipeline_mode = #tpu.pipeline_mode<synchronous>, transform_indices = @transform_5, window_bounds = array<i64: 128, 128>}, {pipeline_mode = #tpu.pipeline_mode<synchronous>, transform_indices = @transform_6, window_bounds = array<i64: 1, 128>}, {transform_indices = @transform_7, window_bounds = array<i64: 2, 32, 128>}]} {
    %c0 = arith.constant 0 : index
    %c0_0 = arith.constant 0 : index
    %c0_1 = arith.constant 0 : index
    %0 = vector.load %arg2[%c0, %c0_0, %c0_1] : memref<2x32x32xbf16, #tpu.memory_space<vmem>>, vector<2x32x32xbf16>
    %1 = vector.shape_cast %0 : vector<2x32x32xbf16> to vector<64x32xbf16>
    %c0_2 = arith.constant 0 : index
    %c0_3 = arith.constant 0 : index
    %2 = vector.load %arg3[%c0_2, %c0_3] : memref<32x384xbf16, #tpu.memory_space<vmem>>, vector<32x384xbf16>
    %cst = arith.constant dense<0.000000e+00> : vector<64x384xf32>
    %3 = tpu.matmul %1, %2, %cst {dimension_numbers = #tpu.dot_dimension_numbers<[1], [0], [0], [1], [0, 0, 1, 1], [], []>} : vector<64x32xbf16>, vector<32x384xbf16>, vector<64x384xf32> -> vector<64x384xf32>
    %c0_4 = arith.constant 0 : index
    %c0_5 = arith.constant 0 : index
    %4 = vector.load %arg4[%c0_4, %c0_5] : memref<1x384xf32, #tpu.memory_space<vmem>>, vector<1x384xf32>
    %5 = vector.broadcast %4 : vector<1x384xf32> to vector<64x384xf32>
    %6 = arith.addf %3, %5 : vector<64x384xf32>
    %7 = vector.shape_cast %6 : vector<64x384xf32> to vector<2x32x384xf32>
    %c3 = arith.constant 3 : index
    %c0_6 = arith.constant 0 : index
    %8 = vector.load %arg5[%c3, %c0_6] : memref<4x384xf32, #tpu.memory_space<vmem>>, vector<1x384xf32>
    %9 = vector.shape_cast %8 : vector<1x384xf32> to vector<1x1x384xf32>
    %10 = vector.broadcast %9 : vector<1x1x384xf32> to vector<2x32x384xf32>
    %11 = arith.mulf %7, %10 : vector<2x32x384xf32>
    %c0_7 = arith.constant 0 : index
    %c0_8 = arith.constant 0 : index
    %12 = vector.load %arg6[%c0_7, %c0_8] : memref<1x384xf32, #tpu.memory_space<vmem>>, vector<1x384xf32>
    %13 = vector.shape_cast %12 : vector<1x384xf32> to vector<1x1x384xf32>
    %14 = vector.broadcast %13 : vector<1x1x384xf32> to vector<2x32x384xf32>
    %15 = arith.addf %11, %14 : vector<2x32x384xf32>
    %c0_i32 = arith.constant 0 : i32
    %16 = arith.cmpi eq, %arg1, %c0_i32 : i32
    %17 = arith.extui %16 : i1 to i32
    %c0_i32_9 = arith.constant 0 : i32
    %18 = arith.cmpi ne, %17, %c0_i32_9 : i32
    scf.if %18 {
      %cst_27 = arith.constant 0.000000e+00 : f32
      %55 = vector.broadcast %cst_27 : f32 to vector<2x8x384xf32>
      %c0_28 = arith.constant 0 : index
      %c0_29 = arith.constant 0 : index
      %c0_30 = arith.constant 0 : index
      %56 = vector.load %arg10[%c0_28, %c0_29, %c0_30] : memref<2x8x384xf32, #tpu.memory_space<vmem>>, vector<2x8x384xf32>
      tpu.vector_store %arg10[%c0_28, %c0_29, %c0_30], %55 {strides = array<i32>} : memref<2x8x384xf32, #tpu.memory_space<vmem>>, vector<2x8x384xf32>,
    } else {
    }
    %c0_10 = arith.constant 0 : index
    %c0_11 = arith.constant 0 : index
    %c0_12 = arith.constant 0 : index
    %19 = vector.load %arg10[%c0_10, %c0_11, %c0_12] : memref<2x8x384xf32, #tpu.memory_space<vmem>>, vector<2x8x384xf32>
    %20 = tpu.concatenate %19, %7 in 1 : vector<2x8x384xf32>, vector<2x32x384xf32> -> vector<2x40x384xf32>
    %21 = vector.extract_strided_slice %20 {offsets = [0, 5, 0], sizes = [2, 32, 384], strides = [1, 1, 1]} : vector<2x40x384xf32> to vector<2x32x384xf32>
    %c0_13 = arith.constant 0 : index
    %c0_14 = arith.constant 0 : index
    %22 = vector.load %arg5[%c0_13, %c0_14] : memref<4x384xf32, #tpu.memory_space<vmem>>, vector<1x384xf32>
    %23 = vector.shape_cast %22 : vector<1x384xf32> to vector<1x1x384xf32>
    %24 = vector.broadcast %23 : vector<1x1x384xf32> to vector<2x32x384xf32>
    %25 = arith.mulf %21, %24 : vector<2x32x384xf32>
    %26 = arith.addf %15, %25 : vector<2x32x384xf32>
    %27 = vector.extract_strided_slice %20 {offsets = [0, 6, 0], sizes = [2, 32, 384], strides = [1, 1, 1]} : vector<2x40x384xf32> to vector<2x32x384xf32>
    %c1 = arith.constant 1 : index
    %c0_15 = arith.constant 0 : index
    %28 = vector.load %arg5[%c1, %c0_15] : memref<4x384xf32, #tpu.memory_space<vmem>>, vector<1x384xf32>
    %29 = vector.shape_cast %28 : vector<1x384xf32> to vector<1x1x384xf32>
    %30 = vector.broadcast %29 : vector<1x1x384xf32> to vector<2x32x384xf32>
    %31 = arith.mulf %27, %30 : vector<2x32x384xf32>
    %32 = arith.addf %26, %31 : vector<2x32x384xf32>
    %33 = vector.extract_strided_slice %20 {offsets = [0, 7, 0], sizes = [2, 32, 384], strides = [1, 1, 1]} : vector<2x40x384xf32> to vector<2x32x384xf32>
    %c2 = arith.constant 2 : index
    %c0_16 = arith.constant 0 : index
    %34 = vector.load %arg5[%c2, %c0_16] : memref<4x384xf32, #tpu.memory_space<vmem>>, vector<1x384xf32>
    %35 = vector.shape_cast %34 : vector<1x384xf32> to vector<1x1x384xf32>
    %36 = vector.broadcast %35 : vector<1x1x384xf32> to vector<2x32x384xf32>
    %37 = arith.mulf %33, %36 : vector<2x32x384xf32>
    %38 = arith.addf %32, %37 : vector<2x32x384xf32>
    %39 = vector.extract_strided_slice %7 {offsets = [0, 29, 0], sizes = [2, 3, 384], strides = [1, 1, 1]} : vector<2x32x384xf32> to vector<2x3x384xf32>
    %c0_17 = arith.constant 0 : index
    %c5 = arith.constant 5 : index
    %c0_18 = arith.constant 0 : index
    %40 = vector.load %arg10[%c0_17, %c5, %c0_18] : memref<2x8x384xf32, #tpu.memory_space<vmem>>, vector<2x3x384xf32>
    tpu.vector_store %arg10[%c0_17, %c5, %c0_18], %39 {strides = array<i32>} : memref<2x8x384xf32, #tpu.memory_space<vmem>>, vector<2x3x384xf32>,
    %41 = vector.extract_strided_slice %38 {offsets = [0, 0, 0], sizes = [2, 32, 128], strides = [1, 1, 1]} : vector<2x32x384xf32> to vector<2x32x128xf32>
    %42 = vector.extract_strided_slice %38 {offsets = [0, 0, 128], sizes = [2, 32, 128], strides = [1, 1, 1]} : vector<2x32x384xf32> to vector<2x32x128xf32>
    %43 = vector.extract_strided_slice %38 {offsets = [0, 0, 256], sizes = [2, 32, 128], strides = [1, 1, 1]} : vector<2x32x384xf32> to vector<2x32x128xf32>
    %44 = arith.mulf %42, %43 : vector<2x32x128xf32>
    %45 = arith.mulf %41, %44 : vector<2x32x128xf32>
    %46 = vector.shape_cast %45 : vector<2x32x128xf32> to vector<64x128xf32>
    %47 = arith.truncf %46 : vector<64x128xf32> to vector<64x128xbf16>
    %c0_19 = arith.constant 0 : index
    %c0_20 = arith.constant 0 : index
    %48 = vector.load %arg7[%c0_19, %c0_20] : memref<128x128xbf16, #tpu.memory_space<vmem>>, vector<128x128xbf16>
    %cst_21 = arith.constant dense<0.000000e+00> : vector<64x128xf32>
    %49 = tpu.matmul %47, %48, %cst_21 {dimension_numbers = #tpu.dot_dimension_numbers<[1], [0], [0], [1], [0, 0, 1, 1], [], []>} : vector<64x128xbf16>, vector<128x128xbf16>, vector<64x128xf32> -> vector<64x128xf32>
    %c0_22 = arith.constant 0 : index
    %c0_23 = arith.constant 0 : index
    %50 = vector.load %arg8[%c0_22, %c0_23] : memref<1x128xf32, #tpu.memory_space<vmem>>, vector<1x128xf32>
    %51 = vector.broadcast %50 : vector<1x128xf32> to vector<64x128xf32>
    %52 = arith.addf %49, %51 : vector<64x128xf32>
    %53 = vector.shape_cast %52 : vector<64x128xf32> to vector<2x32x128xf32>
    %c0_24 = arith.constant 0 : index
    %c0_25 = arith.constant 0 : index
    %c0_26 = arith.constant 0 : index
    %54 = vector.load %arg9[%c0_24, %c0_25, %c0_26] : memref<2x32x128xf32, #tpu.memory_space<vmem>>, vector<2x32x128xf32>
    tpu.vector_store %arg9[%c0_24, %c0_25, %c0_26], %53 {strides = array<i32>} : memref<2x32x128xf32, #tpu.memory_space<vmem>>, vector<2x32x128xf32>,
    return
  }
  func.func @transform_0(%arg0: i32, %arg1: i32) -> (i32, i32, i32) {
    %c0_i32 = arith.constant 0 : i32
    %c0_i32_0 = arith.constant 0 : i32
    return %arg0, %arg1, %c0_i32 : i32, i32, i32
  }
  func.func @transform_1(%arg0: i32, %arg1: i32) -> (i32, i32) {
    %c0_i32 = arith.constant 0 : i32
    %c0_i32_0 = arith.constant 0 : i32
    %c0_i32_1 = arith.constant 0 : i32
    return %c0_i32, %c0_i32_0 : i32, i32
  }
  func.func @transform_2(%arg0: i32, %arg1: i32) -> (i32, i32) {
    %c0_i32 = arith.constant 0 : i32
    %c0_i32_0 = arith.constant 0 : i32
    %c0_i32_1 = arith.constant 0 : i32
    return %c0_i32, %c0_i32_0 : i32, i32
  }
  func.func @transform_3(%arg0: i32, %arg1: i32) -> (i32, i32) {
    %c0_i32 = arith.constant 0 : i32
    %c0_i32_0 = arith.constant 0 : i32
    %c0_i32_1 = arith.constant 0 : i32
    return %c0_i32, %c0_i32_0 : i32, i32
  }
  func.func @transform_4(%arg0: i32, %arg1: i32) -> (i32, i32) {
    %c0_i32 = arith.constant 0 : i32
    %c0_i32_0 = arith.constant 0 : i32
    %c0_i32_1 = arith.constant 0 : i32
    return %c0_i32, %c0_i32_0 : i32, i32
  }
  func.func @transform_5(%arg0: i32, %arg1: i32) -> (i32, i32) {
    %c0_i32 = arith.constant 0 : i32
    %c0_i32_0 = arith.constant 0 : i32
    %c0_i32_1 = arith.constant 0 : i32
    return %c0_i32, %c0_i32_0 : i32, i32
  }
  func.func @transform_6(%arg0: i32, %arg1: i32) -> (i32, i32) {
    %c0_i32 = arith.constant 0 : i32
    %c0_i32_0 = arith.constant 0 : i32
    %c0_i32_1 = arith.constant 0 : i32
    return %c0_i32, %c0_i32_0 : i32, i32
  }
  func.func @transform_7(%arg0: i32, %arg1: i32) -> (i32, i32, i32) {
    %c0_i32 = arith.constant 0 : i32
    %c0_i32_0 = arith.constant 0 : i32
    return %arg0, %arg1, %c0_i32 : i32, i32, i32
  }
}

</mosaic_0001>

<bundles_post_ra>
// kernel: tpu_custom_call.1
= control target key start
LH: loop header
LB: loop body
LE: loop exit
PB: predicated region body
PF: predicated region fallthrough
CT: control target
= control target key end

     0   :  { %s2633_s0 = inlined_call_operand.vmem [shape: bf16[4,64,32], index: 0, kind: input, shape index: {}]   ;;  %s2634_s1 = inlined_call_operand.vmem [shape: bf16[32,384], index: 1, kind: input, shape index: {}]   ;;  %s2635_s2 = inlined_call_operand.vmem [shape: f32[1,384], index: 2, kind: input, shape index: {}]   ;;  %s2636_s3 = inlined_call_operand.vmem [shape: f32[4,384], index: 3, kind: input, shape index: {}]   ;;  %s2637_s4 = inlined_call_operand.vmem [shape: f32[1,384], index: 4, kind: input, shape index: {}]   ;;  %s2638_s5 = inlined_call_operand.vmem [shape: bf16[128,128], index: 5, kind: input, shape index: {}]   ;;  %s2639_s6 = inlined_call_operand.vmem [shape: f32[1,128], index: 6, kind: input, shape index: {}]   ;;  %s2640_s7 = inlined_call_operand.hbm [shape: f32[4,64,128], index: 7, kind: output, shape index: {}]  }
   0x1   :  { %2671 = sst [smem:[#allocation35_spill]] %s2633_s0 }
   0x2   :  { %2672 = sst [smem:[#allocation36_spill]] %s2634_s1 }
   0x3   :  { %12 = vsyncpa [#allocation5], 0 }
   0x4   :  { %14 = vsyncpa [#allocation5 + $0x1], 0  ;;  %s1740_s24 = smov 0   ;;  %s1742_s25 = smov 0  }
   0x5   :  { %s1744_s26 = smov 0   ;;  %s1746_s27 = smov 0  }
   0x6   :  { %s1748_s28 = smov 0   ;;  %s1750_s29 = smov 0  }
   0x7   :  { %s1752_s30 = smov 0   ;;  %s1754_s8 = smov 0  }
   0x8 LB: > { %s1403_s9 = sadd.s32 4294967295, %s1690_s8   ;;  %s1404_s10 = sadd.s32 4294967294, %s1690_s8   ;;  %s1690_s8 = sphi %s1754_s8, %s20_s8   ;;  %s1686_s30 = sphi %s1752_s30, %s2749_s30   ;;  %s1682_s29 = sphi %s1750_s29, %s2748_s29   ;;  %s1678_s28 = sphi %s1748_s28, %s2747_s28   ;;  %s1674_s27 = sphi %s1746_s27, %s2746_s27   ;;  %s1670_s26 = sphi %s1744_s26, %s2745_s26   ;;  %s1666_s25 = sphi %s1742_s25, %s2744_s25   ;;  %s1662_s24 = sphi %s1740_s24, %s2743_s24  }
   0x9   : > { %s29_s11 = sadd.s32 1, %s1682_s29  ;;  %s32_s12 = sadd.s32 1, %s1686_s30 }
   0xa   : > { %p30_p0 = scmp.ge.s32.totalorder %s29_s11, 2  ;;  %p48_p1 = scmp.ne.s32.totalorder %s1670_s26, %s1666_s25 }
   0xb   : > { %p49_p2 = scmp.eq.s32.totalorder %s1690_s8, 0  ;;  %p206_p5 = scmp.eq.s32.totalorder %s1403_s9, 3 }
   0xc   : > { %s2751_s11 = smov (%p30_p0, %s29_s11), 0  ;;  %s2753_s12 = smov (!%p30_p0, %s32_s12), %s1686_s30 }
   0xd   : > { %s37_s13 = ssub.s32 %s1682_s29, %s2751_s11  ;;  %p1792_p3 = por %p49_p2, %p48_p1 }
   0xe   : > { %p34_p4 = scmp.ge.s32.totalorder %s2753_s12, 2  ;;  %p211_p6 = scmp.ne.s32.totalorder %s1666_s25, %s1662_s24 }
   0xf   : > { %p212_p7 = scmp.eq.s32.totalorder %s1404_s10, 3  ;;  %p1800_p8 = por %p206_p5, %p48_p1 }
  0x10   : > { %s2755_s12 = smov (%p34_p4, %s2753_s12), 0  ;;  %s41_s19 = sadd.s32 1, %s1670_s26 }
  0x11   : > { %2674 = sst [smem:[#allocation9_spill]] %s2755_s12  ;;  %p1804_p9 = por %p212_p7, %p211_p6 }
  0x12   : > { %s36_s17 = ssub.s32 %s1686_s30, %s2755_s12  ;;  %p1406_p11 = scmp.ge.s32.totalorder %s1690_s8, 4 }
  0x13   : > { %s38_s18 = sor.u32 %s37_s13, %s36_s17 }
  0x14   : > { %p39_p10 = scmp.eq.s32.totalorder %s38_s18, 0  ;;  %246 = sbr.rel (%p1406_p11) target bundleno = 39 (0x27), region = 40 }
  0x16   : > { %s1812_s20 = scalar_select %p39_p10, %s1670_s26, %s41_s19  }
  0x19   : > { %249 = sbr.rel (!%p1792_p3) target bundleno = 39 (0x27), region = 44  ;;  %s251_s21 = sand.u32 (%p1792_p3), 1, %s1670_s26  }
  0x1a   : > { %s1409_s22 = sshll.u32 (%p1792_p3), %s1682_s29, 2  ;;  %s1407_s23 = sshll.u32 (%p1792_p3), %s251_s21, 5 }
  0x1b   : > { %s1510_s9 = sshll.u32 (%p1792_p3), %s1686_s30, 4  ;;  %s2677_s0 = sld [smem:[#allocation35_spill]] (%p1792_p3) }
  0x1c   : > { %s257_s10 = sadd.s32 (%p1792_p3), %s1510_s9, %s1409_s22  ;;  %s253_s19 = scalar_lea.vmem (%p1792_p3), [#allocation3], %s1407_s23 }
  0x1d   : > { %s1411_s12 = sshll.u32 (%p1792_p3), %s257_s10, 2 }
  0x21   : > { %s259_s18 = scalar_lea.vmem %s2677_s0, %s1411_s12 }
  0x22   : > { %v276_v0 = vld [vmem:[%s259_s18] sm:$0xff]   ;;  %v280_v1 = vld [vmem:[%s259_s18 + $0x8] sm:$0xff]  }
  0x23   : > { %v284_v2 = vld [vmem:[%s259_s18 + $0x20] sm:$0xff]   ;;  %277 = vst [vmem:[%s253_s19] sm:$0xff] %v276_v0   ;;  %v288_v3 = vld [vmem:[%s259_s18 + $0x28] sm:$0xff]  }
  0x24   : > { %281 = vst [vmem:[%s253_s19 + $0x8] sm:$0xff] %v280_v1  }
  0x25   : > { %285 = vst [vmem:[%s253_s19 + $0x10] sm:$0xff] %v284_v2  }
  0x26   : > { %289 = vst [vmem:[%s253_s19 + $0x18] sm:$0xff] %v288_v3  }
  0x27 PF: > { %p1412_p12 = scmp.ge.s32.totalorder %s1690_s8, 1  ;;  %p330_p13 = scmp.lt.s32.totalorder %s1690_s8, 5 }
  0x29   : > { %p331_p0 = pnand %p1412_p12, %p330_p13 }
  0x2b   : > { %334 = sbr.rel (%p331_p0) target bundleno = 521 (0x209), region = 85 }
  0x30   : > { %s2678_s1 = sld [smem:[#allocation36_spill]]  ;;  %s1862_s12 = sand.u32 1, %s1666_s25   ;;  %vm449_vm0 = vcmask 261120   ;;  %v389_v26 = vld [vmem:[%s2635_s2] sm:$0x7] }
  0x31   : > { %s1413_s22 = sshll.u32 %s1862_s12, 5  ;;  %s1414_s23 = sshll.u32 %s1862_s12, 6  ;;  %v1467_v27 = vld [vmem:[%s2636_s3 + $0x3] ss:$4 sm:$0x7]  ;;  %v1884_v28 = vperm.slane %v389_v26, 0 }
  0x32   : > { %s339_s9 = scalar_lea.vmem [#allocation3], %s1413_s22  ;;  %v582_v29 = vld [vmem:[%s2637_s4] sm:$0x7]  ;;  %v1889_v30 = vperm.slane %v389_v26, 1  ;;  %v1891_v31 = vperm.slane %v1467_v27, 0  ;;  %v1893_v33 = vperm.slane %v1467_v27, 1 }
  0x33   : > { %v1511_v22 = vld [vmem:[%s339_s9] sm:$0xff]  ;;  %v1512_v23 = vld [vmem:[%s339_s9 + $0x8] sm:$0xff]  ;;  %v1513_v24 = vld [vmem:[%s339_s9 + $0x10] sm:$0xff]  ;;  %v1898_v35 = vperm.slane %v582_v29, 0  ;;  %v1903_v38 = vperm.slane %v582_v29, 1  ;;  %v1909_v41 = vperm.slane %v389_v26, 2 }
  0x34   : > { %v1514_v25 = vld [vmem:[%s339_s9 + $0x18] sm:$0xff]  ;;  %v1917_v44 = vperm.slane %v1467_v27, 2  ;;  %v1922_v47 = vperm.slane %v582_v29, 2  ;;  %s2099_s21 = scalar_lea.vmem [#allocation4], %s1414_s23  ;;  %p1468_p1 = scmp.ne.s32.totalorder %s1674_s27, 0 }
  0x36   : > { %v1445_v4 = vld [vmem:[%s2678_s1 + $0x18] sm:$0xf]  ;;  %v1519_v5 = vld [vmem:[%s2678_s1 + $0x20] sm:$0xf0]  ;;  %v1518_v6 = vld [vmem:[%s2678_s1 + $0x1c] sm:$0xf] }
  0x37   : > { %v1446_v7 = vor.u32 %v1519_v5, %v1445_v4  ;;  %v1447_v8 = vld [vmem:[%s2678_s1 + $0x24] sm:$0xf0]  ;;  %v1453_v9 = vld [vmem:[%s2678_s1 + $0x20] sm:$0xf]  ;;  %v1520_v10 = vld [vmem:[%s2678_s1 + $0x28] sm:$0xf0] }
  0x38   : > { %v1450_v11 = vor.u32 %v1518_v6, %v1447_v8  ;;  %v1454_v12 = vor.u32 %v1520_v10, %v1453_v9  ;;  %v1433_v13 = vld [vmem:[%s2678_s1] sm:$0xf]  ;;  %v1516_v14 = vld [vmem:[%s2678_s1 + $0x8] sm:$0xf0]  ;;  %v1515_v15 = vld [vmem:[%s2678_s1 + $0x4] sm:$0xf] }
  0x39   : > { %468 = vmatpush.bf16.msra.mxu0 %v1446_v7  ;;  %v1434_v16 = vor.u32 %v1516_v14, %v1433_v13  ;;  %v1435_v17 = vld [vmem:[%s2678_s1 + $0xc] sm:$0xf0]  ;;  %v1441_v18 = vld [vmem:[%s2678_s1 + $0x8] sm:$0xf]  ;;  %v1517_v19 = vld [vmem:[%s2678_s1 + $0x10] sm:$0xf0] }
  0x3a   : > { %497 = vmatpush.bf16.msra.mxu1 %v1450_v11  ;;  %526 = vmatpush.bf16.msra.mxu2 %v1454_v12  ;;  %v1438_v20 = vor.u32 %v1515_v15, %v1435_v17  ;;  %v1442_v21 = vor.u32 %v1517_v19, %v1441_v18 }
  0x3d   : > { %469 = vmatpush.bf16.msra.mxu0 %v1434_v16 }
  0x3e   : > { %498 = vmatpush.bf16.msra.mxu1 %v1438_v20  ;;  %527 = vmatpush.bf16.msra.mxu2 %v1442_v21 }
  0x40   : > { %1455 = vmatmul.msk.bf16.vlgmr.msra.gmra.mxu0 %vm449_vm0, %v1511_v22 }
  0x41   : > { %1459 = vmatmul.msk.bf16.vlgmr.msra.gmra.mxu1 %vm449_vm0, %v1511_v22  ;;  %1463 = vmatmul.msk.bf16.vlgmr.msra.gmra.mxu2 %vm449_vm0, %v1511_v22 }
  0x50   : > { %1456 = vmatmul.msk.bf16.gmra.mxu0 %vm449_vm0, %v1512_v23 }
  0x51   : > { %1460 = vmatmul.msk.bf16.gmra.mxu1 %vm449_vm0, %v1512_v23  ;;  %1464 = vmatmul.msk.bf16.gmra.mxu2 %vm449_vm0, %v1512_v23 }
  0x60   : > { %1457 = vmatmul.msk.bf16.gmra.mxu0 %vm449_vm0, %v1513_v24 }
  0x61   : > { %1461 = vmatmul.msk.bf16.gmra.mxu1 %vm449_vm0, %v1513_v24  ;;  %1465 = vmatmul.msk.bf16.gmra.mxu2 %vm449_vm0, %v1513_v24 }
  0x70   : > { %1458 = vmatmul.msk.bf16.gmra.mxu0 %vm449_vm0, %v1514_v25 }
  0x71   : > { %1462 = vmatmul.msk.bf16.gmra.mxu1 %vm449_vm0, %v1514_v25  ;;  %1466 = vmatmul.msk.bf16.gmra.mxu2 %vm449_vm0, %v1514_v25 }
  0xbd   : > { %v471_v32 = vpop.f32.mrf.mxu0 }
  0xbe   : > { %v1896_v34 = vadd.f32 %v471_v32, %v1884_v28  ;;  %v500_v36 = vpop.f32.mrf.mxu1 }
  0xbf   : > { %v1901_v37 = vadd.f32 %v500_v36, %v1889_v30 }
  0xc0   : > { %v558_v39 = vmul.f32 %v1891_v31, %v1896_v34 }
  0xc1   : > { %v559_v40 = vmul.f32 %v1893_v33, %v1901_v37 }
  0xc2   : > { %v1912_v42 = vadd.f32 %v1898_v35, %v558_v39 }
  0xc3   : > { %v1915_v43 = vadd.f32 %v1903_v38, %v559_v40 }
  0xc4   : > { %2679 = vst [vmem:[#allocation10_spill] sm:$0xff] %v1912_v42  ;;  %v529_v45 = vpop.f32.mrf.mxu2 }
  0xc5   : > { %2680 = vst [vmem:[#allocation11_spill] sm:$0xff] %v1915_v43  ;;  %v1920_v46 = vadd.f32 %v529_v45, %v1909_v41  ;;  %v473_v48 = vpop.f32.mrf.mxu0 }
  0xc6   : > { %v1925_v49 = vadd.f32 %v473_v48, %v1884_v28  ;;  %v502_v50 = vpop.f32.mrf.mxu1 }
  0xc7   : > { %2681 = vst [vmem:[#allocation12_spill] sm:$0xff] %v1920_v46  ;;  %v560_v51 = vmul.f32 %v1917_v44, %v1920_v46  ;;  %v1930_v52 = vadd.f32 %v502_v50, %v1889_v30 }
  0xc8   : > { %v561_v53 = vmul.f32 %v1891_v31, %v1925_v49 }
  0xc9   : > { %v1935_v54 = vadd.f32 %v1922_v47, %v560_v51  ;;  %v562_v55 = vmul.f32 %v1893_v33, %v1930_v52 }
  0xca   : > { %v1940_v56 = vadd.f32 %v1898_v35, %v561_v53 }
  0xcb   : > { %2682 = vst [vmem:[#allocation13_spill] sm:$0xff] %v1935_v54  ;;  %v1943_v57 = vadd.f32 %v1903_v38, %v562_v55 }
  0xcc   : > { %2683 = vst [vmem:[#allocation14_spill] sm:$0xff] %v1940_v56  ;;  %v531_v58 = vpop.f32.mrf.mxu2 }
  0xcd   : > { %2684 = vst [vmem:[#allocation15_spill] sm:$0xff] %v1943_v57  ;;  %v1946_v59 = vadd.f32 %v531_v58, %v1909_v41  ;;  %v476_v60 = vpop.f32.mrf.mxu0 }
  0xce   : > { %v1949_v61 = vadd.f32 %v476_v60, %v1884_v28  ;;  %v505_v62 = vpop.f32.mrf.mxu1 }
  0xcf   : > { %v563_v63 = vmul.f32 %v1917_v44, %v1946_v59  ;;  %v1954_v0 = vadd.f32 %v505_v62, %v1889_v30 }
  0xd0   : > { %v564_v1 = vmul.f32 %v1891_v31, %v1949_v61 }
  0xd1   : > { %v1959_v2 = vadd.f32 %v1922_v47, %v563_v63  ;;  %v565_v3 = vmul.f32 %v1893_v33, %v1954_v0 }
  0xd2   : > { %v1964_v4 = vadd.f32 %v1898_v35, %v564_v1 }
  0xd3   : > { %2685 = vst [vmem:[#allocation16_spill] sm:$0xff] %v1959_v2  ;;  %v1967_v5 = vadd.f32 %v1903_v38, %v565_v3 }
  0xd4   : > { %v534_v6 = vpop.f32.mrf.mxu2 }
  0xd5   : > { %v1970_v7 = vadd.f32 %v534_v6, %v1909_v41  ;;  %v478_v8 = vpop.f32.mrf.mxu0 }
  0xd6   : > { %v1973_v9 = vadd.f32 %v478_v8, %v1884_v28  ;;  %v507_v10 = vpop.f32.mrf.mxu1 }
  0xd7   : > { %v566_v11 = vmul.f32 %v1917_v44, %v1970_v7  ;;  %v1978_v12 = vadd.f32 %v507_v10, %v1889_v30 }
  0xd8   : > { %v567_v13 = vmul.f32 %v1891_v31, %v1973_v9 }
  0xd9   : > { %v1983_v14 = vadd.f32 %v1922_v47, %v566_v11  ;;  %v568_v15 = vmul.f32 %v1893_v33, %v1978_v12 }
  0xda   : > { %v1988_v16 = vadd.f32 %v1898_v35, %v567_v13 }
  0xdb   : > { %v1991_v17 = vadd.f32 %v1903_v38, %v568_v15 }
  0xdc   : > { %v536_v18 = vpop.f32.mrf.mxu2 }
  0xdd   : > { %v1994_v19 = vadd.f32 %v536_v18, %v1909_v41  ;;  %v481_v20 = vpop.f32.mrf.mxu0 }
  0xde   : > { %v1997_v21 = vadd.f32 %v481_v20, %v1884_v28  ;;  %v510_v22 = vpop.f32.mrf.mxu1 }
  0xdf   : > { %v569_v23 = vmul.f32 %v1917_v44, %v1994_v19  ;;  %v2002_v24 = vadd.f32 %v510_v22, %v1889_v30 }
  0xe0   : > { %v570_v25 = vmul.f32 %v1891_v31, %v1997_v21 }
  0xe1   : > { %v2007_v26 = vadd.f32 %v1922_v47, %v569_v23  ;;  %v571_v27 = vmul.f32 %v1893_v33, %v2002_v24 }
  0xe2   : > { %v2012_v29 = vadd.f32 %v1898_v35, %v570_v25 }
  0xe3   : > { %v2015_v32 = vadd.f32 %v1903_v38, %v571_v27 }
  0xe4   : > { %v539_v36 = vpop.f32.mrf.mxu2 }
  0xe5   : > { %v2018_v39 = vadd.f32 %v539_v36, %v1909_v41  ;;  %v483_v40 = vpop.f32.mrf.mxu0 }
  0xe6   : > { %v2021_v45 = vadd.f32 %v483_v40, %v1884_v28  ;;  %v512_v48 = vpop.f32.mrf.mxu1 }
  0xe7   : > { %v572_v50 = vmul.f32 %v1917_v44, %v2018_v39  ;;  %v2026_v51 = vadd.f32 %v512_v48, %v1889_v30 }
  0xe8   : > { %v573_v53 = vmul.f32 %v1891_v31, %v2021_v45 }
  0xe9   : > { %v2031_v55 = vadd.f32 %v1922_v47, %v572_v50  ;;  %v574_v58 = vmul.f32 %v1893_v33, %v2026_v51 }
  0xea   : > { %v2036_v60 = vadd.f32 %v1898_v35, %v573_v53 }
  0xeb   : > { %v2039_v62 = vadd.f32 %v1903_v38, %v574_v58 }
  0xec   : > { %v541_v63 = vpop.f32.mrf.mxu2 }
  0xed   : > { %v2042_v1 = vadd.f32 %v541_v63, %v1909_v41  ;;  %v486_v3 = vpop.f32.mrf.mxu0 }
  0xee   : > { %v2045_v6 = vadd.f32 %v486_v3, %v1884_v28  ;;  %v515_v8 = vpop.f32.mrf.mxu1 }
  0xef   : > { %v575_v10 = vmul.f32 %v1917_v44, %v2042_v1  ;;  %v2050_v11 = vadd.f32 %v515_v8, %v1889_v30 }
  0xf0   : > { %2686 = vst [vmem:[#allocation17_spill] sm:$0xff] %v2045_v6  ;;  %v576_v13 = vmul.f32 %v1891_v31, %v2045_v6 }
  0xf1   : > { %2687 = vst [vmem:[#allocation18_spill] sm:$0xff] %v2050_v11  ;;  %v2055_v15 = vadd.f32 %v1922_v47, %v575_v10  ;;  %v577_v18 = vmul.f32 %v1893_v33, %v2050_v11 }
  0xf2   : > { %v2060_v20 = vadd.f32 %v1898_v35, %v576_v13 }
  0xf3   : > { %v2063_v22 = vadd.f32 %v1903_v38, %v577_v18 }
  0xf4   : > { %2688 = vst [vmem:[#allocation19_spill] sm:$0xff] %v2060_v20  ;;  %v544_v23 = vpop.f32.mrf.mxu2 }
  0xf5   : > { %2689 = vst [vmem:[#allocation20_spill] sm:$0xff] %v2063_v22  ;;  %v2066_v25 = vadd.f32 %v544_v23, %v1909_v41  ;;  %v488_v27 = vpop.f32.mrf.mxu0 }
  0xf6   : > { %v2069_v36 = vadd.f32 %v488_v27, %v1884_v28  ;;  %v517_v40 = vpop.f32.mrf.mxu1 }
  0xf7   : > { %2690 = vst [vmem:[#allocation21_spill] sm:$0xff] %v2066_v25  ;;  %v578_v48 = vmul.f32 %v1917_v44, %v2066_v25  ;;  %v2074_v50 = vadd.f32 %v517_v40, %v1889_v30 }
  0xf8   : > { %2691 = vst [vmem:[#allocation22_spill] sm:$0xff] %v2069_v36  ;;  %v579_v53 = vmul.f32 %v1891_v31, %v2069_v36 }
  0xf9   : > { %2692 = vst [vmem:[#allocation23_spill] sm:$0xff] %v2074_v50  ;;  %v2079_v58 = vadd.f32 %v1922_v47, %v578_v48  ;;  %v580_v63 = vmul.f32 %v1893_v33, %v2074_v50 }
  0xfa   : > { %v2084_v3 = vadd.f32 %v1898_v35, %v579_v53 }
  0xfb   : > { %2693 = vst [vmem:[#allocation24_spill] sm:$0xff] %v2079_v58  ;;  %v2087_v28 = vadd.f32 %v1903_v38, %v580_v63 }
  0xfc   : > { %2694 = vst [vmem:[#allocation25_spill] sm:$0xff] %v2084_v3  ;;  %v546_v8 = vpop.f32.mrf.mxu2 }
  0xfd   : > { %2695 = vst [vmem:[#allocation26_spill] sm:$0xff] %v2087_v28  ;;  %v2090_v10 = vadd.f32 %v546_v8, %v1909_v41 }
  0xff   : > { %2696 = vst [vmem:[#allocation27_spill] sm:$0xff] %v2090_v10  ;;  %v581_v30 = vmul.f32 %v1917_v44, %v2090_v10  ;;  %617 = sbr.rel (%p1468_p1) target bundleno = 267 (0x10b), region = 93 }
 0x101   : > { %v2095_v31 = vadd.f32 %v1922_v47, %v581_v30 }
 0x103   : > { %2697 = vst [vmem:[#allocation28_spill] sm:$0xff] %v2095_v31 }
 0x104   : > { %v1692_v33 = vmov 0.0  }
 0x105   : > { %618 = vst [vmem:[#allocation2 + $0x28] sm:$0xff] %v1692_v33 }
 0x106   : > { %619 = vst [vmem:[#allocation2 + $0x10] sm:$0xff] %v1692_v33 }
 0x107   : > { %620 = vst [vmem:[#allocation2 + $0x8] sm:$0xff] %v1692_v33 }
 0x108   : > { %621 = vst [vmem:[#allocation2] sm:$0xff] %v1692_v33 }
 0x109   : > { %622 = vst [vmem:[#allocation2 + $0x18] sm:$0xff] %v1692_v33 }
 0x10a   : > { %623 = vst [vmem:[#allocation2 + $0x20] sm:$0xff] %v1692_v33 }
 0x10b PF: > { %v1528_v35 = vld [vmem:[%s2638_s5 + $0x38] sm:$0xff]  ;;  %v1527_v38 = vld [vmem:[%s2638_s5 + $0x30] sm:$0xff]  ;;  %v630_v41 = vld [vmem:[%s2636_s3] ss:$4 sm:$0x7]  ;;  %vm698_vm1 = vcmask 1042432  }
 0x10c   : > { %1530 = vmatpush.bf16.msra.mxu3 %v1528_v35  ;;  %1239 = vmatpush.bf16.msrb.mxu0 %v1528_v35  ;;  %v2111_v44 = vperm.slane %v630_v41, 0  ;;  %v2113_v47 = vperm.slane %v630_v41, 1  ;;  %v2115_v13 = vperm.slane %v630_v41, 2  ;;  %v1469_v18 = vld [vmem:[%s2636_s3 + $0x1] ss:$4 sm:$0x7] }
 0x10d   : > { %v2120_v23 = vperm.slane %v1469_v18, 0  ;;  %v2122_v27 = vperm.slane %v1469_v18, 1  ;;  %v2124_v40 = vperm.slane %v1469_v18, 2  ;;  %v1526_v48 = vld [vmem:[%s2638_s5 + $0x28] sm:$0xff]  ;;  %vm870_vm2 = vcmask 1041408   ;;  %s1277_s18 = scalar_lea.sflag [#allocation5], %s1862_s12 }
 0x10e   : > { %v2131_v53 = vmul.f32 %v2111_v44, %v1925_v49  ;;  %v2135_v63 = vmul.f32 %v2113_v47, %v1930_v52  ;;  %v2139_v8 = vmul.f32 %v2115_v13, %v1946_v59  ;;  %v647_v30 = vmul.f32 %v2111_v44, %v1949_v61 }
 0x10f   : > { %v648_v33 = vmul.f32 %v2113_v47, %v1954_v0  ;;  %v649_v35 = vmul.f32 %v2115_v13, %v1970_v7  ;;  %v650_v41 = vmul.f32 %v2111_v44, %v1973_v9  ;;  %v651_v18 = vmul.f32 %v2113_v47, %v1978_v12  ;;  %v2151_v31 = vld [vmem:[#allocation2] sm:$0xff] }
 0x110   : > { %2698 = vst [vmem:[#allocation29_spill] sm:$0xff] %v2131_v53  ;;  %1531 = vmatpush.bf16.msra.mxu3 %v1527_v38  ;;  %v2153_v28 = vld [vmem:[#allocation2 + $0x18] sm:$0xff]  ;;  %v652_v3 = vmul.f32 %v2115_v13, %v1994_v19  ;;  %v2654_v22 = vrot.slane %v2135_v63, 5  ;;  %1240 = vmatpush.bf16.msrb.mxu0 %v1527_v38  ;;  %v714_v11 = vrot.slane %v647_v30, 5  ;;  %v2166_v58 = vmul.f32 %v2120_v23, %v1925_v49  ;;  %v1525_v38 = vld [vmem:[%s2638_s5 + $0x20] sm:$0xff] }
 0x111   : > { %2699 = vst [vmem:[#allocation30_spill] sm:$0xff] %v2135_v63  ;;  %v2160_v25 = vld [vmem:[#allocation2 + $0x20] sm:$0xff]  ;;  %v716_v6 = vrot.slane %v648_v33, 5  ;;  %v718_v2 = vrot.slane %v649_v35, 5  ;;  %v720_v57 = vrot.slane %v650_v41, 5  ;;  %v722_v56 = vrot.slane %v651_v18, 5 }
 0x112   : > { %2700 = vst [vmem:[#allocation31_spill] sm:$0xff] %v2139_v8  ;;  %v724_v54 = vrot.slane %v652_v3, 5  ;;  %v2170_v20 = vmul.f32 %v2122_v27, %v1930_v52  ;;  %v2703_v30 = vrot.slane %v2131_v53, 5  ;;  %v2704_v35 = vrot.slane %v2139_v8, 5 }
 0x113   : > { %1148 = vst [vmem:[#allocation2] sm:$0xe0] %v2069_v36  ;;  %v717_v3 = vsel %vm698_vm1, %v2654_v22, %v716_v6  ;;  %v721_v18 = vsel %vm698_vm1, %v714_v11, %v720_v57  ;;  %v2196_v57 = vmul.f32 %v2124_v40, %v1946_v59  ;;  %vm1042_vm3 = vcmask 1040384  }
 0x114   : > { %1149 = vst [vmem:[#allocation2 + $0x18] sm:$0xe0] %v2074_v50  ;;  %1532 = vmatpush.bf16.msra.mxu3 %v1526_v48  ;;  %v715_v33 = vsel %vm698_vm1, %v2703_v30, %v714_v11  ;;  %v719_v41 = vsel %vm698_vm1, %v2704_v35, %v718_v2  ;;  %v725_v50 = vsel %vm698_vm1, %v718_v2, %v724_v54 }
 0x115   : > { %2701 = vst [vmem:[#allocation32_spill] sm:$0xff] %v2166_v58  ;;  %v783_v36 = vadd.f32 %v715_v33, %v1964_v4  ;;  %v784_v43 = vadd.f32 %v717_v3, %v1967_v5  ;;  %1241 = vmatpush.bf16.msrb.mxu0 %v1526_v48  ;;  %v785_v30 = vadd.f32 %v719_v41, %v1983_v14  ;;  %v1524_v4 = vld [vmem:[%s2638_s5 + $0x18] sm:$0xff]  ;;  %v884_v11 = vrot.slane %v2196_v57, 6 }
 0x116   : > { %2702 = vst [vmem:[#allocation33_spill] sm:$0xff] %v2170_v20  ;;  %v786_v42 = vadd.f32 %v721_v18, %v1988_v16  ;;  %v788_v8 = vadd.f32 %v725_v50, %v2007_v26  ;;  %v819_v54 = vmul.f32 %v2120_v23, %v1949_v61  ;;  %v821_v2 = vmul.f32 %v2124_v40, %v1970_v7  ;;  %v1470_v26 = vld [vmem:[%s2636_s3 + $0x2] ss:$4 sm:$0x7] }
 0x117   : > { %1150 = vst [vmem:[#allocation2 + $0x20] sm:$0xe0] %v2090_v10  ;;  %v723_v10 = vsel %vm698_vm1, %v716_v6, %v722_v56  ;;  %v820_v56 = vmul.f32 %v2122_v27, %v1954_v0  ;;  %v822_v5 = vmul.f32 %v2120_v23, %v1973_v9  ;;  %v823_v14 = vmul.f32 %v2122_v27, %v1978_v12 }
 0x118   : > { %v787_v22 = vadd.f32 %v723_v10, %v1991_v17  ;;  %2705 = vst [vmem:[#allocation34_spill] sm:$0xff] %v2196_v57  ;;  %1533 = vmatpush.bf16.msra.mxu3 %v1525_v38  ;;  %v824_v16 = vmul.f32 %v2124_v40, %v1994_v19  ;;  %v2659_v17 = vrot.slane %v2166_v58, 6  ;;  %v2658_v6 = vrot.slane %v2170_v20, 6 }
 0x119   : > { %v886_v50 = vrot.slane %v819_v54, 6  ;;  %v888_v10 = vrot.slane %v820_v56, 6  ;;  %1242 = vmatpush.bf16.msrb.mxu0 %v1525_v38  ;;  %v890_v48 = vrot.slane %v821_v2, 6  ;;  %v892_v33 = vrot.slane %v822_v5, 6  ;;  %v1523_v38 = vld [vmem:[%s2638_s5 + $0x10] sm:$0xff] }
 0x11a   : > { %v894_v3 = vrot.slane %v823_v14, 6  ;;  %v896_v35 = vrot.slane %v824_v16, 6  ;;  %v2225_v63 = vperm.slane %v1470_v26, 0  ;;  %v2227_v53 = vperm.slane %v1470_v26, 1 }
 0x11b   : > { %v887_v41 = vsel %vm870_vm2, %v2659_v17, %v886_v50  ;;  %v889_v18 = vsel %vm870_vm2, %v2658_v6, %v888_v10  ;;  %v891_v54 = vsel %vm870_vm2, %v884_v11, %v890_v48  ;;  %v893_v56 = vsel %vm870_vm2, %v886_v50, %v892_v33 }
 0x11c   : > { %1534 = vmatpush.bf16.msra.mxu3 %v1524_v4  ;;  %v895_v2 = vsel %vm870_vm2, %v888_v10, %v894_v3  ;;  %v897_v5 = vsel %vm870_vm2, %v890_v48, %v896_v35  ;;  %v955_v14 = vadd.f32 %v887_v41, %v783_v36  ;;  %v956_v16 = vadd.f32 %v889_v18, %v784_v43  ;;  %v2270_v3 = vld [vmem:[#allocation2 + $0x10] sm:$0xff] }
 0x11d   : > { %v957_v6 = vadd.f32 %v891_v54, %v785_v30  ;;  %v958_v17 = vadd.f32 %v893_v56, %v786_v42  ;;  %1243 = vmatpush.bf16.msrb.mxu0 %v1524_v4  ;;  %v959_v20 = vadd.f32 %v895_v2, %v787_v22  ;;  %v960_v58 = vadd.f32 %v897_v5, %v788_v8  ;;  %v1522_v22 = vld [vmem:[%s2638_s5 + $0x8] sm:$0xff] }
 0x11e   : > { %v2238_v46 = vperm.slane %v1470_v26, 2  ;;  %v2242_v57 = vmul.f32 %v2225_v63, %v1925_v49  ;;  %v2246_v50 = vmul.f32 %v2227_v53, %v1930_v52  ;;  %v991_v10 = vmul.f32 %v2225_v63, %v1949_v61  ;;  %1146 = vst [vmem:[#allocation2 + $0x10] sm:$0xe0] %v1978_v12 }
 0x11f   : > { %v992_v43 = vmul.f32 %v2227_v53, %v1954_v0  ;;  %v994_v42 = vmul.f32 %v2225_v63, %v1973_v9  ;;  %v995_v61 = vmul.f32 %v2227_v53, %v1978_v12  ;;  %v653_v18 = vmul.f32 %v2111_v44, %v2151_v31  ;;  %v2290_v12 = vld [vmem:[#allocation2 + $0x28] sm:$0xff] }
 0x120   : > { %1535 = vmatpush.bf16.msra.mxu3 %v1523_v38  ;;  %v2259_v49 = vmul.f32 %v2238_v46, %v1946_v59  ;;  %v993_v52 = vmul.f32 %v2238_v46, %v1970_v7  ;;  %v996_v0 = vmul.f32 %v2238_v46, %v1994_v19  ;;  %v1052_v36 = vrot.slane %v2242_v57, 7  ;;  %1145 = vst [vmem:[#allocation2 + $0x28] sm:$0xe0] %v1973_v9 }
 0x121   : > { %v2665_v8 = vrot.slane %v2246_v50, 7  ;;  %v1058_v30 = vrot.slane %v991_v10, 7  ;;  %v1060_v4 = vrot.slane %v992_v43, 7  ;;  %1244 = vmatpush.bf16.msrb.mxu0 %v1523_v38  ;;  %v1064_v48 = vrot.slane %v994_v42, 7  ;;  %v1521_v38 = vld [vmem:[%s2638_s5] sm:$0xff] }
 0x122   : > { %v2666_v26 = vrot.slane %v2259_v49, 7  ;;  %v1062_v59 = vrot.slane %v993_v52, 7  ;;  %v1066_v33 = vrot.slane %v995_v61, 7  ;;  %v1068_v41 = vrot.slane %v996_v0, 7 }
 0x123   : > { %v1059_v7 = vsel %vm1042_vm3, %v1052_v36, %v1058_v30  ;;  %v1061_v35 = vsel %vm1042_vm3, %v2665_v8, %v1060_v4  ;;  %v1065_v56 = vsel %vm1042_vm3, %v1058_v30, %v1064_v48  ;;  %v654_v8 = vmul.f32 %v2113_v47, %v2153_v28  ;;  %v2296_v30 = vld [vmem:[#allocation2 + $0x8] sm:$0xff] }
 0x124   : > { %1536 = vmatpush.bf16.msra.mxu3 %v1522_v22  ;;  %v1063_v54 = vsel %vm1042_vm3, %v2666_v26, %v1062_v59  ;;  %v1067_v2 = vsel %vm1042_vm3, %v1060_v4, %v1066_v33  ;;  %v1127_v5 = vadd.f32 %v1059_v7, %v955_v14  ;;  %v1069_v10 = vsel %vm1042_vm3, %v1062_v59, %v1068_v41 }
 0x125   : > { %v1128_v43 = vadd.f32 %v1061_v35, %v956_v16  ;;  %v1129_v42 = vadd.f32 %v1063_v54, %v957_v6  ;;  %v1130_v52 = vadd.f32 %v1065_v56, %v958_v17  ;;  %1245 = vmatpush.bf16.msrb.mxu0 %v1522_v22  ;;  %v1131_v61 = vadd.f32 %v1067_v2, %v959_v20 }
 0x126   : > { %v1132_v0 = vadd.f32 %v1069_v10, %v960_v58  ;;  %v655_v26 = vmul.f32 %v2115_v13, %v2160_v25  ;;  %v656_v6 = vmul.f32 %v2111_v44, %v1997_v21  ;;  %v657_v17 = vmul.f32 %v2113_v47, %v2002_v24  ;;  %1147 = vst [vmem:[#allocation2 + $0x8] sm:$0xe0] %v1994_v19 }
 0x127   : > { %v1153_v14 = vmul.f32 %v1129_v42, %v1128_v43  ;;  %v658_v20 = vmul.f32 %v2115_v13, %v2018_v39  ;;  %v2308_v16 = vmul.f32 %v2111_v44, %v2021_v45  ;;  %v2312_v9 = vmul.f32 %v2113_v47, %v2026_v51 }
 0x128   : > { %1537 = vmatpush.bf16.msra.mxu3 %v1521_v38  ;;  %v1154_v58 = vmul.f32 %v1132_v0, %v1131_v61  ;;  %v2316_v22 = vmul.f32 %v2115_v13, %v2042_v1  ;;  %v726_v59 = vrot.slane %v653_v18, 5  ;;  %v727_v48 = vrot.slane %v656_v6, 5 }
 0x129   : > { %v1161_v4 = vmul.f32 %v1153_v14, %v1127_v5  ;;  %v729_v33 = vrot.slane %v654_v8, 5  ;;  %1246 = vmatpush.bf16.msrb.mxu0 %v1521_v38  ;;  %v730_v7 = vrot.slane %v657_v17, 5  ;;  %v732_v35 = vrot.slane %v655_v26, 5 }
 0x12a   : > { %v1162_v19 = vmul.f32 %v1154_v58, %v1130_v52  ;;  %v733_v41 = vrot.slane %v658_v20, 5  ;;  %v728_v54 = vsel %vm698_vm1, %v726_v59, %v727_v48  ;;  %v735_v56 = vrot.slane %v2308_v16, 5 }
 0x12b   : > { %v737_v2 = vrot.slane %v2312_v9, 5  ;;  %v739_v10 = vrot.slane %v2316_v22, 5  ;;  %v731_v42 = vsel %vm698_vm1, %v729_v33, %v730_v7  ;;  %v789_v8 = vadd.f32 %v728_v54, %v2012_v29  ;;  %v2735_v9 = vld [vmem:[#allocation25_spill] sm:$0xff]  ;;  %v2737_v22 = vld [vmem:[#allocation28_spill] sm:$0xff] }
 0x12c   : > { %v1168_v43 = vpack.c.bf16 %v1162_v19, %v1161_v4  ;;  %v734_v18 = vsel %vm698_vm1, %v732_v35, %v733_v41  ;;  %v736_v26 = vsel %vm698_vm1, %v727_v48, %v735_v56  ;;  %v790_v52 = vadd.f32 %v731_v42, %v2015_v32 }
 0x12d   : > { %v738_v38 = vsel %vm698_vm1, %v730_v7, %v737_v2  ;;  %v740_v5 = vsel %vm698_vm1, %v733_v41, %v739_v10  ;;  %v791_v61 = vadd.f32 %v734_v18, %v2031_v55  ;;  %v792_v0 = vadd.f32 %v736_v26, %v2036_v60 }
 0x12e   : > { %1252 = vmatmul.bf16.vlgmr.msra.gmra.mxu3 %v1168_v43  ;;  %v793_v29 = vadd.f32 %v738_v38, %v2039_v62  ;;  %v794_v14 = vadd.f32 %v740_v5, %v2055_v15  ;;  %v825_v6 = vmul.f32 %v2120_v23, %v2151_v31  ;;  %v826_v17 = vmul.f32 %v2122_v27, %v2153_v28 }
 0x12f   : > { %v827_v20 = vmul.f32 %v2124_v40, %v2160_v25  ;;  %v828_v32 = vmul.f32 %v2120_v23, %v1997_v21  ;;  %v829_v55 = vmul.f32 %v2122_v27, %v2002_v24  ;;  %v830_v60 = vmul.f32 %v2124_v40, %v2018_v39 }
 0x130   : > { %v2353_v62 = vmul.f32 %v2120_v23, %v2021_v45  ;;  %v2357_v15 = vmul.f32 %v2122_v27, %v2026_v51  ;;  %v2361_v58 = vmul.f32 %v2124_v40, %v2042_v1  ;;  %v898_v4 = vrot.slane %v825_v6, 6 }
 0x131   : > { %v899_v59 = vrot.slane %v828_v32, 6  ;;  %v901_v48 = vrot.slane %v826_v17, 6  ;;  %v902_v33 = vrot.slane %v829_v55, 6  ;;  %v904_v19 = vrot.slane %v827_v20, 6 }
 0x132   : > { %v905_v7 = vrot.slane %v830_v60, 6  ;;  %v907_v35 = vrot.slane %v2353_v62, 6  ;;  %v909_v54 = vrot.slane %v2357_v15, 6  ;;  %v2670_v43 = vrot.slane %v2361_v58, 6 }
 0x133   : > { %v900_v41 = vsel %vm870_vm2, %v898_v4, %v899_v59  ;;  %v997_v42 = vmul.f32 %v2225_v63, %v2151_v31  ;;  %v903_v18 = vsel %vm870_vm2, %v901_v48, %v902_v33  ;;  %v998_v4 = vmul.f32 %v2227_v53, %v2153_v28 }
 0x134   : > { %v906_v26 = vsel %vm870_vm2, %v904_v19, %v905_v7  ;;  %v908_v38 = vsel %vm870_vm2, %v899_v59, %v907_v35  ;;  %v961_v5 = vadd.f32 %v900_v41, %v789_v8  ;;  %v910_v6 = vsel %vm870_vm2, %v902_v33, %v909_v54 }
 0x135   : > { %v912_v17 = vsel %vm870_vm2, %v905_v7, %v2670_v43  ;;  %v962_v20 = vadd.f32 %v903_v18, %v790_v52  ;;  %v963_v32 = vadd.f32 %v906_v26, %v791_v61  ;;  %v964_v31 = vadd.f32 %v908_v38, %v792_v0 }
 0x136   : > { %v965_v55 = vadd.f32 %v910_v6, %v793_v29  ;;  %v966_v60 = vadd.f32 %v912_v17, %v794_v14  ;;  %v999_v59 = vmul.f32 %v2238_v46, %v2160_v25  ;;  %v1000_v8 = vmul.f32 %v2225_v63, %v1997_v21 }
 0x137   : > { %v1001_v48 = vmul.f32 %v2227_v53, %v2002_v24  ;;  %v1002_v33 = vmul.f32 %v2238_v46, %v2018_v39  ;;  %v2392_v52 = vmul.f32 %v2225_v63, %v2021_v45  ;;  %v2396_v61 = vmul.f32 %v2227_v53, %v2026_v51 }
 0x138   : > { %v2400_v25 = vmul.f32 %v2238_v46, %v2042_v1  ;;  %v1070_v28 = vrot.slane %v997_v42, 7  ;;  %v1071_v21 = vrot.slane %v1000_v8, 7  ;;  %v1073_v0 = vrot.slane %v998_v4, 7 }
 0x139   : > { %v1074_v29 = vrot.slane %v1001_v48, 7  ;;  %v1076_v24 = vrot.slane %v999_v59, 7  ;;  %v1077_v14 = vrot.slane %v1002_v33, 7  ;;  %v2669_v39 = vrot.slane %v2392_v52, 7 }
 0x13a   : > { %v2668_v19 = vrot.slane %v2396_v61, 7  ;;  %v2667_v45 = vrot.slane %v2400_v25, 7  ;;  %v1072_v7 = vsel %vm1042_vm3, %v1070_v28, %v1071_v21  ;;  %v638_v1 = vmul.f32 %v2111_v44, %v2290_v12 }
 0x13b   : > { %v1075_v51 = vsel %vm1042_vm3, %v1073_v0, %v1074_v29  ;;  %v639_v41 = vmul.f32 %v2113_v47, %v2270_v3  ;;  %v1078_v42 = vsel %vm1042_vm3, %v1076_v24, %v1077_v14  ;;  %v1080_v18 = vsel %vm1042_vm3, %v1071_v21, %v2669_v39 }
 0x13c   : > { %v1082_v26 = vsel %vm1042_vm3, %v1074_v29, %v2668_v19  ;;  %v1084_v38 = vsel %vm1042_vm3, %v1077_v14, %v2667_v45  ;;  %v1133_v6 = vadd.f32 %v1072_v7, %v961_v5  ;;  %v1134_v17 = vadd.f32 %v1075_v51, %v962_v20  ;;  %v2706_v29 = vld [vmem:[#allocation12_spill] sm:$0xff] }
 0x13d   : > { %v1135_v4 = vadd.f32 %v1078_v42, %v963_v32  ;;  %v1136_v59 = vadd.f32 %v1080_v18, %v964_v31  ;;  %v1137_v8 = vadd.f32 %v1082_v26, %v965_v55  ;;  %v1138_v48 = vadd.f32 %v1084_v38, %v966_v60  ;;  %v2707_v26 = vld [vmem:[#allocation29_spill] sm:$0xff] }
 0x13e   : > { %v640_v33 = vmul.f32 %v2115_v13, %v2296_v30  ;;  %v641_v28 = vmul.f32 %v2111_v44, %v1896_v34  ;;  %v642_v0 = vmul.f32 %v2113_v47, %v1901_v37  ;;  %v643_v24 = vmul.f32 %v2115_v13, %v2706_v29 }
 0x13f   : > { %v1155_v21 = vmul.f32 %v1135_v4, %v1134_v17  ;;  %v699_v14 = vrot.slane %v638_v1, 5  ;;  %v1156_v5 = vmul.f32 %v1138_v48, %v1137_v8  ;;  %v702_v32 = vrot.slane %v639_v41, 5 }
 0x140   : > { %v700_v20 = vrot.slane %v641_v28, 5  ;;  %v705_v31 = vrot.slane %v640_v33, 5  ;;  %v703_v60 = vrot.slane %v642_v0, 5  ;;  %v706_v7 = vrot.slane %v643_v24, 5  ;;  %v2711_v33 = vld [vmem:[#allocation31_spill] sm:$0xff]  ;;  %v2713_v0 = vld [vmem:[#allocation10_spill] sm:$0xff] }
 0x141   : > { %v1163_v55 = vmul.f32 %v1155_v21, %v1133_v6  ;;  %v810_v51 = vmul.f32 %v2120_v23, %v2290_v12  ;;  %v1164_v42 = vmul.f32 %v1156_v5, %v1136_v59  ;;  %v2708_v38 = vrot.slane %v2707_v26, 5  ;;  %v2709_v6 = vld [vmem:[#allocation30_spill] sm:$0xff] }
 0x142   : > { %v701_v18 = vsel %vm698_vm1, %v699_v14, %v700_v20  ;;  %v811_v1 = vmul.f32 %v2122_v27, %v2270_v3  ;;  %v704_v4 = vsel %vm698_vm1, %v702_v32, %v703_v60  ;;  %v707_v41 = vsel %vm698_vm1, %v705_v31, %v706_v7  ;;  %v2714_v14 = vld [vmem:[#allocation11_spill] sm:$0xff]  ;;  %v2718_v31 = vld [vmem:[#allocation16_spill] sm:$0xff] }
 0x143   : > { %v709_v17 = vsel %vm698_vm1, %v700_v20, %v2708_v38  ;;  %v2710_v8 = vrot.slane %v2709_v6, 5  ;;  %v2712_v28 = vrot.slane %v2711_v33, 5  ;;  %v1169_v21 = vpack.c.bf16 %v1164_v42, %v1163_v55  ;;  %v2715_v20 = vld [vmem:[#allocation13_spill] sm:$0xff]  ;;  %v2716_v38 = vld [vmem:[#allocation14_spill] sm:$0xff]  ;;  %v2717_v32 = vld [vmem:[#allocation15_spill] sm:$0xff] }
 0x144   : > { %v777_v24 = vadd.f32 %v701_v18, %v2713_v0  ;;  %v778_v5 = vadd.f32 %v704_v4, %v2714_v14  ;;  %v779_v26 = vadd.f32 %v707_v41, %v2715_v20  ;;  %v780_v45 = vadd.f32 %v709_v17, %v2716_v38  ;;  %v2719_v14 = vld [vmem:[#allocation32_spill] sm:$0xff]  ;;  %v2721_v38 = vld [vmem:[#allocation33_spill] sm:$0xff] }
 0x145   : > { %v711_v48 = vsel %vm698_vm1, %v703_v60, %v2710_v8  ;;  %v713_v59 = vsel %vm698_vm1, %v706_v7, %v2712_v28  ;;  %v812_v60 = vmul.f32 %v2124_v40, %v2296_v30  ;;  %1257 = vmatmul.bf16.gmra.mxu3 %v1169_v21  ;;  %v813_v7 = vmul.f32 %v2120_v23, %v1896_v34 }
 0x146   : > { %v781_v19 = vadd.f32 %v711_v48, %v2717_v32  ;;  %v782_v39 = vadd.f32 %v713_v59, %v2718_v31  ;;  %v814_v55 = vmul.f32 %v2122_v27, %v1901_v37  ;;  %v815_v42 = vmul.f32 %v2124_v40, %v2706_v29 }
 0x147   : > { %v871_v18 = vrot.slane %v810_v51, 6  ;;  %v874_v4 = vrot.slane %v811_v1, 6  ;;  %v877_v17 = vrot.slane %v812_v60, 6  ;;  %v982_v41 = vmul.f32 %v2225_v63, %v2290_v12 }
 0x148   : > { %v983_v6 = vmul.f32 %v2227_v53, %v2270_v3  ;;  %v872_v8 = vrot.slane %v813_v7, 6  ;;  %v875_v48 = vrot.slane %v814_v55, 6  ;;  %v878_v33 = vrot.slane %v815_v42, 6 }
 0x149   : > { %v984_v28 = vmul.f32 %v2238_v46, %v2296_v30  ;;  %v985_v59 = vmul.f32 %v2225_v63, %v1896_v34  ;;  %v986_v51 = vmul.f32 %v2227_v53, %v1901_v37  ;;  %v987_v1 = vmul.f32 %v2238_v46, %v2706_v29 }
 0x14a   : > { %v1043_v21 = vrot.slane %v982_v41, 7  ;;  %v873_v12 = vsel %vm870_vm2, %v871_v18, %v872_v8  ;;  %v876_v3 = vsel %vm870_vm2, %v874_v4, %v875_v48  ;;  %v879_v0 = vsel %vm870_vm2, %v877_v17, %v878_v33 }
 0x14b   : > { %v2720_v20 = vrot.slane %v2719_v14, 6  ;;  %v2722_v32 = vrot.slane %v2721_v38, 6  ;;  %v885_v37 = vsel %vm870_vm2, %v878_v33, %v884_v11  ;;  %v949_v29 = vadd.f32 %v873_v12, %v777_v24  ;;  %v2725_v38 = vld [vmem:[#allocation18_spill] sm:$0xff] }
 0x14c   : > { %v950_v60 = vadd.f32 %v876_v3, %v778_v5  ;;  %v951_v7 = vadd.f32 %v879_v0, %v779_v26  ;;  %v954_v18 = vadd.f32 %v885_v37, %v782_v39  ;;  %v1044_v4 = vrot.slane %v985_v59, 7  ;;  %v2729_v3 = vld [vmem:[#allocation22_spill] sm:$0xff]  ;;  %v2731_v0 = vld [vmem:[#allocation27_spill] sm:$0xff] }
 0x14d   : > { %v881_v30 = vsel %vm870_vm2, %v872_v8, %v2720_v20  ;;  %v883_v34 = vsel %vm870_vm2, %v875_v48, %v2722_v32  ;;  %v1046_v17 = vrot.slane %v983_v6, 7  ;;  %v1047_v41 = vrot.slane %v986_v51, 7  ;;  %v2724_v8 = vld [vmem:[#allocation17_spill] sm:$0xff] }
 0x14e   : > { %v952_v55 = vadd.f32 %v881_v30, %v780_v45  ;;  %v953_v42 = vadd.f32 %v883_v34, %v781_v19  ;;  %v1049_v14 = vrot.slane %v984_v28, 7  ;;  %v1050_v43 = vrot.slane %v987_v1, 7  ;;  %v2726_v32 = vld [vmem:[#allocation21_spill] sm:$0xff] }
 0x14f   : > { %v662_v20 = vmul.f32 %v2111_v44, %v2724_v8  ;;  %v663_v48 = vmul.f32 %v2113_v47, %v2725_v38  ;;  %v664_v11 = vmul.f32 %v2115_v13, %v2726_v32  ;;  %v1045_v24 = vsel %vm1042_vm3, %v1043_v21, %v1044_v4 }
 0x150   : > { %v1048_v45 = vsel %vm1042_vm3, %v1046_v17, %v1047_v41  ;;  %v1053_v39 = vsel %vm1042_vm3, %v1044_v4, %v1052_v36  ;;  %v2727_v19 = vrot.slane %v2246_v50, 7  ;;  %v1051_v26 = vsel %vm1042_vm3, %v1049_v14, %v1050_v43  ;;  %v2730_v36 = vld [vmem:[#allocation23_spill] sm:$0xff]  ;;  %v2733_v14 = vld [vmem:[#allocation20_spill] sm:$0xff] }
 0x151   : > { %v2728_v6 = vrot.slane %v2259_v49, 7  ;;  %v1121_v28 = vadd.f32 %v1045_v24, %v949_v29  ;;  %v1122_v59 = vadd.f32 %v1048_v45, %v950_v60  ;;  %v1123_v51 = vadd.f32 %v1051_v26, %v951_v7 }
 0x152   : > { %v1055_v5 = vsel %vm1042_vm3, %v1047_v41, %v2727_v19  ;;  %v1124_v1 = vadd.f32 %v1053_v39, %v952_v55  ;;  %v665_v57 = vmul.f32 %v2111_v44, %v2729_v3  ;;  %v666_v50 = vmul.f32 %v2113_v47, %v2730_v36 }
 0x153   : > { %v1057_v33 = vsel %vm1042_vm3, %v1050_v43, %v2728_v6  ;;  %v1125_v21 = vadd.f32 %v1055_v5, %v953_v42  ;;  %v667_v30 = vmul.f32 %v2115_v13, %v2731_v0  ;;  %v741_v34 = vrot.slane %v662_v20, 5 }
 0x154   : > { %v1126_v12 = vadd.f32 %v1057_v33, %v954_v18  ;;  %v1151_v31 = vmul.f32 %v1123_v51, %v1122_v59  ;;  %v743_v37 = vrot.slane %v663_v48, 5  ;;  %v745_v43 = vrot.slane %v664_v11, 5  ;;  %v2734_v48 = vld [vmem:[#allocation24_spill] sm:$0xff] }
 0x155   : > { %v742_v29 = vsel %vm698_vm1, %v735_v56, %v741_v34  ;;  %v747_v60 = vrot.slane %v665_v57, 5  ;;  %v749_v7 = vrot.slane %v666_v50, 5  ;;  %v751_v55 = vrot.slane %v667_v30, 5  ;;  %v2732_v56 = vld [vmem:[#allocation19_spill] sm:$0xff] }
 0x156   : > { %v1152_v49 = vmul.f32 %v1126_v12, %v1125_v21  ;;  %v1159_v42 = vmul.f32 %v1151_v31, %v1121_v28  ;;  %v744_v47 = vsel %vm698_vm1, %v737_v2, %v743_v37  ;;  %v746_v13 = vsel %vm698_vm1, %v739_v10, %v745_v43  ;;  %v2736_v2 = vld [vmem:[#allocation26_spill] sm:$0xff] }
 0x157   : > { %v748_v18 = vsel %vm698_vm1, %v741_v34, %v747_v60  ;;  %v750_v4 = vsel %vm698_vm1, %v743_v37, %v749_v7  ;;  %v752_v16 = vsel %vm698_vm1, %v745_v43, %v751_v55  ;;  %v795_v17 = vadd.f32 %v742_v29, %v2732_v56 }
 0x158   : > { %v1160_v44 = vmul.f32 %v1152_v49, %v1124_v1  ;;  %v796_v20 = vadd.f32 %v744_v47, %v2733_v14  ;;  %v797_v11 = vadd.f32 %v746_v13, %v2734_v48  ;;  %v798_v24 = vadd.f32 %v748_v18, %v2735_v9 }
 0x159   : > { %v799_v45 = vadd.f32 %v750_v4, %v2736_v2  ;;  %v800_v39 = vadd.f32 %v752_v16, %v2737_v22  ;;  %v834_v10 = vmul.f32 %v2120_v23, %v2724_v8  ;;  %v835_v19 = vmul.f32 %v2122_v27, %v2725_v38 }
 0x15a   : > { %v1167_v41 = vpack.c.bf16 %v1160_v44, %v1159_v42  ;;  %v836_v5 = vmul.f32 %v2124_v40, %v2726_v32  ;;  %v837_v26 = vmul.f32 %v2120_v23, %v2729_v3  ;;  %v838_v6 = vmul.f32 %v2122_v27, %v2730_v36 }
 0x15b   : > { %v839_v33 = vmul.f32 %v2124_v40, %v2731_v0  ;;  %v913_v28 = vrot.slane %v834_v10, 6  ;;  %v915_v59 = vrot.slane %v835_v19, 6  ;;  %v1006_v51 = vmul.f32 %v2225_v63, %v2724_v8 }
 0x15c   : > { %1247 = vmatmul.bf16.vlgmr.msrb.gmra.mxu0 %v1167_v41  ;;  %v1007_v1 = vmul.f32 %v2227_v53, %v2725_v38  ;;  %v917_v21 = vrot.slane %v836_v5, 6  ;;  %v919_v12 = vrot.slane %v837_v26, 6  ;;  %v921_v57 = vrot.slane %v838_v6, 6 }
 0x15d   : > { %v923_v50 = vrot.slane %v839_v33, 6  ;;  %v914_v23 = vsel %vm870_vm2, %v907_v35, %v913_v28  ;;  %v916_v27 = vsel %vm870_vm2, %v909_v54, %v915_v59  ;;  %v1008_v40 = vmul.f32 %v2238_v46, %v2726_v32 }
 0x15e   : > { %v1009_v8 = vmul.f32 %v2225_v63, %v2729_v3  ;;  %v2738_v38 = vrot.slane %v2361_v58, 6  ;;  %v920_v34 = vsel %vm870_vm2, %v913_v28, %v919_v12  ;;  %v922_v62 = vsel %vm870_vm2, %v915_v59, %v921_v57 }
 0x15f   : > { %v924_v35 = vsel %vm870_vm2, %v917_v21, %v923_v50  ;;  %v967_v31 = vadd.f32 %v914_v23, %v795_v17  ;;  %v968_v15 = vadd.f32 %v916_v27, %v796_v20  ;;  %v970_v54 = vadd.f32 %v920_v34, %v798_v24 }
 0x160   : > { %v918_v30 = vsel %vm870_vm2, %v2738_v38, %v917_v21  ;;  %v971_v37 = vadd.f32 %v922_v62, %v799_v45  ;;  %v972_v43 = vadd.f32 %v924_v35, %v800_v39  ;;  %v1010_v32 = vmul.f32 %v2227_v53, %v2730_v36 }
 0x161   : > { %v969_v49 = vadd.f32 %v918_v30, %v797_v11  ;;  %v1011_v63 = vmul.f32 %v2238_v46, %v2731_v0  ;;  %v1085_v58 = vrot.slane %v1006_v51, 7  ;;  %v1087_v3 = vrot.slane %v1007_v1, 7  ;;  %v1623_v11 = vld [vmem:[%s2639_s6] ss:$0 sm:$0xff] }
 0x162   : > { %v1089_v29 = vrot.slane %v1008_v40, 7  ;;  %v1091_v60 = vrot.slane %v1009_v8, 7  ;;  %v1093_v7 = vrot.slane %v1010_v32, 7  ;;  %v2739_v42 = vrot.slane %v2392_v52, 7 }
 0x163   : > { %v1095_v55 = vrot.slane %v1011_v63, 7  ;;  %v2740_v47 = vrot.slane %v2396_v61, 7  ;;  %v2741_v18 = vrot.slane %v2400_v25, 7 }
 0x164   : > { %v1086_v44 = vsel %vm1042_vm3, %v2739_v42, %v1085_v58  ;;  %v1092_v46 = vsel %vm1042_vm3, %v1085_v58, %v1091_v60  ;;  %v1094_v36 = vsel %vm1042_vm3, %v1087_v3, %v1093_v7 }
 0x165   : > { %v1088_v13 = vsel %vm1042_vm3, %v2740_v47, %v1087_v3  ;;  %v1090_v53 = vsel %vm1042_vm3, %v2741_v18, %v1089_v29  ;;  %v1096_v0 = vsel %vm1042_vm3, %v1089_v29, %v1095_v55  ;;  %v1139_v4 = vadd.f32 %v1086_v44, %v967_v31 }
 0x166   : > { %v1140_v16 = vadd.f32 %v1088_v13, %v968_v15  ;;  %v1141_v52 = vadd.f32 %v1090_v53, %v969_v49  ;;  %v1142_v56 = vadd.f32 %v1092_v46, %v970_v54  ;;  %v1143_v17 = vadd.f32 %v1094_v36, %v971_v37 }
 0x167   : > { %v1144_v61 = vadd.f32 %v1096_v0, %v972_v43 }
 0x168   : > { %v1157_v41 = vmul.f32 %v1141_v52, %v1140_v16 }
 0x169   : > { %v1158_v14 = vmul.f32 %v1144_v61, %v1143_v17 }
 0x16a   : > { %v1165_v25 = vmul.f32 %v1157_v41, %v1139_v4 }
 0x16b   : > { %v1166_v20 = vmul.f32 %v1158_v14, %v1142_v56 }
 0x16d   : > { %v1170_v48 = vpack.c.bf16 %v1166_v20, %v1165_v25 }
 0x16f   : > { %1262 = vmatmul.bf16.gmra.mxu3 %v1170_v48 }
 0x1b1   : > { %v1253_v9 = vpop.f32.mrf.mxu3 }
 0x1b2   : > { %v1254_v24 = vadd.f32 %v1623_v11, %v1253_v9 }
 0x1b4   : > { %1270 = vst [vmem:[%s2099_s21 + $0x10] sm:$0xff] %v1254_v24 }
 0x1b9   : > { %v1255_v2 = vpop.f32.mrf.mxu3 }
 0x1ba   : > { %v1256_v45 = vadd.f32 %v1623_v11, %v1255_v2 }
 0x1bc   : > { %1271 = vst [vmem:[%s2099_s21 + $0x18] sm:$0xff] %v1256_v45 }
 0x1c8   : > { %v1258_v22 = vpop.f32.mrf.mxu3 }
 0x1c9   : > { %v1259_v39 = vadd.f32 %v1623_v11, %v1258_v22 }
 0x1cb   : > { %1272 = vst [vmem:[%s2099_s21 + $0x20] sm:$0xff] %v1259_v39 }
 0x1d0   : > { %v1260_v10 = vpop.f32.mrf.mxu3 }
 0x1d1   : > { %v1261_v19 = vadd.f32 %v1623_v11, %v1260_v10 }
 0x1d3   : > { %1273 = vst [vmem:[%s2099_s21 + $0x28] sm:$0xff] %v1261_v19 }
 0x1d9   : > { %v1248_v5 = vpop.f32.mrf.mxu0 }
 0x1da   : > { %v1249_v26 = vadd.f32 %v1623_v11, %v1248_v5 }
 0x1dc   : > { %1268 = vst [vmem:[%s2099_s21] sm:$0xff] %v1249_v26 }
 0x1e1   : > { %v1250_v6 = vpop.f32.mrf.mxu0 }
 0x1e2   : > { %v1251_v33 = vadd.f32 %v1623_v11, %v1250_v6 }
 0x1e4   : > { %1269 = vst [vmem:[%s2099_s21 + $0x8] sm:$0xff] %v1251_v33 }
 0x1f2   : > { %v1263_v28 = vpop.f32.mrf.mxu3 }
 0x1f3   : > { %v1264_v59 = vadd.f32 %v1623_v11, %v1263_v28 }
 0x1f5   : > { %1274 = vst [vmem:[%s2099_s21 + $0x30] sm:$0xff] %v1264_v59 }
 0x1fa   : > { %v1265_v51 = vpop.f32.mrf.mxu3 }
 0x1fb   : > { %v1266_v1 = vadd.f32 %v1623_v11, %v1265_v51 }
 0x1fd   : > { %1275 = vst [vmem:[%s2099_s21 + $0x38] sm:$0xff] %v1266_v1 }
 0x1fe   : > { %s1505_s19 = sshll.u32 %s1674_s27, 2  ;;  %s1529_s14 = sshll.u32 %s1678_s28, 4 }
 0x1ff   : > { %s1289_s22 = sadd.s32 %s1529_s14, %s1505_s19  ;;  %s1302_s9 = sshll.u32 %s2099_s21, 4  ;;  %s1303_s9 = int_to_ptr.vmem [resolvable:$true] %s1302_s9 }
 0x200   : > { %s1507_s10 = sshll.u32 %s1289_s22, 3  ;;  %s1693_s0 = smov 512  }
 0x201   : > { %s1291_s17 = scalar_lea.hbm %s2640_s7, %s1507_s10  ;;  %1538 = sst [smem:[#allocation7]] (%p1800_p8), %s1693_s0 }
 0x202   : > { %s1304_s12 = sshll.u32 %s1291_s17, 4  ;;  %s1694_s1 = smov 1024   ;;  %s1305_s12 = int_to_ptr.hbm [resolvable:$true] %s1304_s12 }
 0x203   : > { %1539 = sst [smem:[#allocation7 + $0x1]] (%p1800_p8), %s1694_s1  ;;  %s1695_s27 = smov 4  }
 0x204   : > { %1540 = sst [smem:[#allocation7 + $0x2]] (%p1800_p8), %s1695_s27  ;;  %s1696_s28 = smov 128  }
 0x205   : > { %1541 = sst [smem:[#allocation7 + $0x3]] (%p1800_p8), %s1696_s28  ;;  %s1697_s21 = smov 8  }
 0x206   : > { %1542 = sst [smem:[#allocation7 + $0x4]] (%p1800_p8), %s1696_s28  ;;  %s1698_s19 = smov [#allocation6]  }
 0x207   : > { %1543 = sst [smem:[#allocation7 + $0x5]] (%p1800_p8), %s1697_s21  ;;  %s1699_s14 = smov 0  }
 0x208   : > { %1544 = dma.general (%p1800_p8), %s1303_s9, 1024, %s1305_s12, %s1277_s18, %s1698_s19, [#allocation7], %s1699_s14, 0  }
 0x209 PF: > { %p1550_p2 = scmp.ge.s32.totalorder %s1690_s8, 2  ;;  %s1332_s0 = sand.u32 1, %s1662_s24  }
 0x20a   : > { %s1333_s1 = scalar_lea.sflag [#allocation5], %s1332_s0 }
 0x20b   : > { %p1547_p3 = pnand %p1550_p2, %p1804_p9 }
 0x20d   : > { %p1548_p4 = pneg %p1547_p3 }
 0x20f   : > { %1657 = dma.done.wait (%p1548_p4), %s1333_s1, 1024  }
 0x210   : > { %1659 = vsyncadd (%p1548_p4), %s1333_s1, 4294966272  ;;  %s20_s8 = sadd.s32 1, %s1690_s8   ;;  %s2742_s15 = sld [smem:[#allocation9_spill]] }
 0x211   : > { %p17_p5 = scmp.ge.s32.totalorder %s20_s8, 6   ;;  %s2743_s24 = smov %s1666_s25 }
 0x212   : > { %s2744_s25 = smov %s1670_s26  ;;  %s2745_s26 = smov %s1812_s20 }
 0x213   : > { %s2746_s27 = smov %s1682_s29  ;;  %s2747_s28 = smov %s1686_s30 }
 0x214   : > { %s2748_s29 = smov %s2751_s11  ;;  %19 = sbr.rel (!%p17_p5) target bundleno = 8 (0x8), region = 141 }
 0x216   : > { %s2749_s30 = smov %s2742_s15 }
 0x219   :  { %1339 = vsyncpa [#allocation5], 1 }
 0x21a   :  { %1341 = vsyncpa [#allocation5 + $0x1], 1 }

</bundles_post_ra>
